<compile_context>
chip_gen: v7x
topology: tpu7x:2x2x1
jax: 0.10.0
libtpu: 0.0.40
codegen_flags: <defaults>
</compile_context>

<pallas_src>
import math
import functools

import jax
import jax.numpy as jnp
from jax.experimental import pallas as pl
from jax.experimental.pallas import tpu as pltpu

LN_EPS = 1e-5          # torch.nn.LayerNorm default
NEG_INF = -1e30        # finite masked-fill value (bf16/f32 safe, no NaN on full-mask rows)
VMEM_LIMIT = 48 * 1024 * 1024   # > v5e/v6e scoped defaults, < v7x physical 64 MiB


# ----------------------------- shared math helpers ---------------------------
def _layer_norm(x, w, b):
    mu = jnp.mean(x, axis=-1, keepdims=True)
    xc = x - mu
    var = jnp.mean(xc * xc, axis=-1, keepdims=True)
    return xc * jax.lax.rsqrt(var + LN_EPS) * w + b


def _gelu(x):
    # exact GELU (torch nn.GELU default, erf-based)
    return 0.5 * x * (1.0 + jax.lax.erf(x / math.sqrt(2.0)))


# --------------------------------- kernels -----------------------------------
def _stack_kernel(n_head, n_unmasked,
                  x_ref,
                  ln1_w, ln1_b, wqkv, bqkv, wp, bp,
                  ln2_w, ln2_b, w1, b1, w2, b2,
                  out_ref, x_sc):
    """Whole transformer stack for one batch element; grid=(B, L), L innermost."""
    layer = pl.program_id(1)
    n_layers = pl.num_programs(1)

    @pl.when(layer == 0)
    def _():
        x_sc[...] = x_ref[0].astype(jnp.float32)

    x = x_sc[...]                                    # (T, C) f32 residual carry
    T, C = x.shape
    hd = C // n_head
    scale = 1.0 / math.sqrt(hd)

    # --- causal self-attention (dropout p=0 -> identity) ---
    h = _layer_norm(x, ln1_w[0], ln1_b[0]).astype(jnp.bfloat16)
    # fused QKV: one (T,C)@(C,3C) matmul, f32 accumulation
    qkv = jnp.dot(h, wqkv[0], preferred_element_type=jnp.float32) + bqkv[0]
    q = qkv[:, :C] * scale                           # scale folded into q (f32)
    k = qkv[:, C:2 * C]
    v = qkv[:, 2 * C:]

    # causal mask with bidirectional n_unmasked prefix, generated in-kernel
    row = jax.lax.broadcasted_iota(jnp.int32, (T, T), 0)
    col = jax.lax.broadcasted_iota(jnp.int32, (T, T), 1)
    allow = (col <= row) | ((row < n_unmasked) & (col < n_unmasked))

    heads = []
    for hi in range(n_head):                         # static unroll over heads
        sl = slice(hi * hd, (hi + 1) * hd)
        qh = q[:, sl].astype(jnp.bfloat16)
        kh = k[:, sl].astype(jnp.bfloat16)
        vh = v[:, sl].astype(jnp.bfloat16)
        att = jax.lax.dot_general(qh, kh, (((1,), (1,)), ((), ())),
                                  preferred_element_type=jnp.float32)   # (T, T)
        att = jnp.where(allow, att, NEG_INF)
        att = att - jnp.max(att, axis=-1, keepdims=True)
        e = jnp.exp(att)
        p = e * pl.reciprocal(jnp.sum(e, axis=-1, keepdims=True), approx=True)
        heads.append(jnp.dot(p.astype(jnp.bfloat16), vh,
                             preferred_element_type=jnp.float32))       # (T, hd)

    y = jnp.concatenate(heads, axis=-1).astype(jnp.bfloat16)            # (T, C)
    # single full-width output projection (T,C)@(C,C)
    y = jnp.dot(y, wp[0], preferred_element_type=jnp.float32) + bp[0]
    x = x + y

    # --- MLP: Linear(C,4C) -> GELU -> Linear(4C,C), dropout p=0 ---
    h2 = _layer_norm(x, ln2_w[0], ln2_b[0]).astype(jnp.bfloat16)
    m = jnp.dot(h2, w1[0], preferred_element_type=jnp.float32) + b1[0]
    m = _gelu(m).astype(jnp.bfloat16)
    m = jnp.dot(m, w2[0], preferred_element_type=jnp.float32) + b2[0]
    x = x + m

    x_sc[...] = x

    @pl.when(layer == n_layers - 1)
    def _():
        out_ref[0] = x


def _head_kernel(x_ref, lnf_w, lnf_b, wh, out_ref):
    """ln_f + head (no bias) for one batch element and one vocab tile."""
    x = x_ref[0]                                     # (T, C) f32
    h = _layer_norm(x, lnf_w[...], lnf_b[...]).astype(jnp.bfloat16)
    out_ref[0] = jnp.dot(h, wh[...], preferred_element_type=jnp.float32)


# ------------------------------ pallas wrappers -------------------------------
_STACK_PARAM_ORDER = ("ln1_w", "ln1_b", "wqkv", "bqkv", "wp", "bp",
                      "ln2_w", "ln2_b", "w1", "b1", "w2", "b2")


def _choose_tile(n, candidates=(1024, 512, 256, 128)):
    for c in candidates:
        if n % c == 0:
            return c
    return n          # fall back to the full (un-tiled) extent


def pack_block_params(blocks):
    """Stack per-layer params along a leading L axis; fuse QKV; cast matmul weights to bf16."""
    def stack(name, dtype=None):
        a = jnp.stack([lp[name] for lp in blocks], axis=0)
        return a.astype(dtype) if dtype is not None else a

    return {
        "ln1_w": stack("ln1_w"), "ln1_b": stack("ln1_b"),
        "wqkv": jnp.stack([jnp.concatenate([lp["wq"], lp["wk"], lp["wv"]], axis=1)
                           for lp in blocks], axis=0).astype(jnp.bfloat16),
        "bqkv": jnp.stack([jnp.concatenate([lp["bq"], lp["bk"], lp["bv"]], axis=1)
                           for lp in blocks], axis=0),
        "wp": stack("wp", jnp.bfloat16), "bp": stack("bp"),
        "ln2_w": stack("ln2_w"), "ln2_b": stack("ln2_b"),
        "w1": stack("w1", jnp.bfloat16), "b1": stack("b1"),
        "w2": stack("w2", jnp.bfloat16), "b2": stack("b2"),
    }


def run_blocks(x, packed, *, n_head, n_unmasked):
    B, T, C = x.shape
    params = [packed[k] for k in _STACK_PARAM_ORDER]
    L = packed["wqkv"].shape[0]
    w_specs = [pl.BlockSpec((1,) + tuple(p.shape[1:]), lambda b, l: (l, 0, 0))
               for p in params]
    return pl.pallas_call(
        functools.partial(_stack_kernel, n_head, n_unmasked),
        out_shape=jax.ShapeDtypeStruct((B, T, C), jnp.float32),
        grid=(B, L),
        in_specs=[pl.BlockSpec((1, T, C), lambda b, l: (b, 0, 0))] + w_specs,
        out_specs=pl.BlockSpec((1, T, C), lambda b, l: (b, 0, 0)),
        scratch_shapes=[pltpu.VMEM((T, C), jnp.float32)],
        compiler_params=pltpu.CompilerParams(
            dimension_semantics=("parallel", "arbitrary"),
            vmem_limit_bytes=VMEM_LIMIT),
    )(x, *params)


def run_head(x, lnf_w, lnf_b, head_w_bf16):
    B, T, C = x.shape
    V = head_w_bf16.shape[1]
    tile_v = _choose_tile(V)
    return pl.pallas_call(
        _head_kernel,
        out_shape=jax.ShapeDtypeStruct((B, T, V), jnp.float32),
        grid=(B, V // tile_v),
        in_specs=[pl.BlockSpec((1, T, C), lambda b, v: (b, 0, 0)),
                  pl.BlockSpec(lnf_w.shape, lambda b, v: (0, 0)),
                  pl.BlockSpec(lnf_b.shape, lambda b, v: (0, 0)),
                  pl.BlockSpec((C, tile_v), lambda b, v: (0, v))],
        out_specs=pl.BlockSpec((1, T, tile_v), lambda b, v: (b, 0, v)),
        compiler_params=pltpu.CompilerParams(
            dimension_semantics=("parallel", "parallel"),
            vmem_limit_bytes=VMEM_LIMIT),
    )(x, lnf_w, lnf_b, head_w_bf16)


# --------------------------- model (params + forward) -------------------------
def init_params(key, *, vocab_size, block_size, n_layer, n_head, n_embd, n_unmasked):
    std = 0.02
    keys = iter(jax.random.split(key, 8 * n_layer + 8))

    def normal(shape):
        return std * jax.random.normal(next(keys), shape, jnp.float32)

    C = n_embd
    params = {
        "tok_emb": normal((vocab_size, C)),                    # nn.Embedding weight
        "pos_emb": jnp.zeros((1, block_size, C), jnp.float32),
        "lnf_w": jnp.ones((1, C), jnp.float32),
        "lnf_b": jnp.zeros((1, C), jnp.float32),
        "head_w": normal((C, vocab_size)),                     # head (no bias), (in,out)
        "blocks": [],
    }
    for _ in range(n_layer):
        params["blocks"].append({
            "ln1_w": jnp.ones((1, C), jnp.float32), "ln1_b": jnp.zeros((1, C), jnp.float32),
            "wq": normal((C, C)), "bq": jnp.zeros((1, C), jnp.float32),
            "wk": normal((C, C)), "bk": jnp.zeros((1, C), jnp.float32),
            "wv": normal((C, C)), "bv": jnp.zeros((1, C), jnp.float32),
            "wp": normal((C, C)), "bp": jnp.zeros((1, C), jnp.float32),
            "ln2_w": jnp.ones((1, C), jnp.float32), "ln2_b": jnp.zeros((1, C), jnp.float32),
            "w1": normal((C, 4 * C)), "b1": jnp.zeros((1, 4 * C), jnp.float32),
            "w2": normal((4 * C, C)), "b2": jnp.zeros((1, C), jnp.float32),
        })
    return params


def warp_gpt_forward(params, idx, warpkwargs=None, embeddings=None, targets=None,
                     *, n_head, block_size, n_unmasked):
    tok = params["tok_emb"][idx]                               # (B, T, C) gather (glue)
    if embeddings is not None:
        tok = jnp.concatenate((embeddings, tok), axis=1)
    t = tok.shape[1]
    assert t <= block_size, "Cannot forward, model block size is exhausted."
    pos = params["pos_emb"][:, :t, :]                          # (1, T, C)

    # TODO(synk): self.warper comes from instantiate_from_config(warper_config) — no
    # concrete warper module is specified in the reference, so the warp is an identity here.
    tok, pos = tok, pos

    x = tok + pos                                              # drop(p=0.0) -> identity

    packed = pack_block_params(params["blocks"])
    x = run_blocks(x, packed, n_head=n_head, n_unmasked=n_unmasked)
    logits = run_head(x, params["lnf_w"], params["lnf_b"],
                      params["head_w"].astype(jnp.bfloat16))

    loss = None
    if targets is not None:
        logp = jax.nn.log_softmax(logits, axis=-1)
        loss = -jnp.mean(jnp.take_along_axis(logp, targets[..., None], axis=-1))
    return logits, loss


# --------------------------- pure-JAX f32 reference ---------------------------
def ref_forward(params, idx, *, n_head, n_unmasked):
    tok = params["tok_emb"][idx]
    B, T, C = tok.shape
    x = tok + params["pos_emb"][:, :T, :]
    hd = C // n_head
    row = jnp.arange(T)[:, None]
    col = jnp.arange(T)[None, :]
    allow = (col <= row) | ((row < n_unmasked) & (col < n_unmasked))
    for lp in params["blocks"]:
        h = _layer_norm(x, lp["ln1_w"], lp["ln1_b"])
        q = (h @ lp["wq"] + lp["bq"]).reshape(B, T, n_head, hd).transpose(0, 2, 1, 3)
        k = (h @ lp["wk"] + lp["bk"]).reshape(B, T, n_head, hd).transpose(0, 2, 1, 3)
        v = (h @ lp["wv"] + lp["bv"]).reshape(B, T, n_head, hd).transpose(0, 2, 1, 3)
        att = (q @ jnp.swapaxes(k, -1, -2)) / math.sqrt(hd)
        att = jnp.where(allow, att, -jnp.inf)
        att = jax.nn.softmax(att, axis=-1)
        y = (att @ v).transpose(0, 2, 1, 3).reshape(B, T, C)
        x = x + y @ lp["wp"] + lp["bp"]
        h2 = _layer_norm(x, lp["ln2_w"], lp["ln2_b"])
        m = _gelu(h2 @ lp["w1"] + lp["b1"])
        x = x + m @ lp["w2"] + lp["b2"]
    h = _layer_norm(x, params["lnf_w"], params["lnf_b"])
    return h @ params["head_w"]


# ------------------------------------ main ------------------------------------
if __name__ == "__main__":
    # small config consistent with the module (n_unmasked must be nonzero for WarpGPT)
    vocab_size = 64
    block_size = 16
    n_layer = 2
    n_head = 4
    n_embd = 32
    n_unmasked = 4
    B, T = 2, 8

    key = jax.random.PRNGKey(0)
    kparams, kidx = jax.random.split(key)
    params = init_params(kparams, vocab_size=vocab_size, block_size=block_size,
                         n_layer=n_layer, n_head=n_head, n_embd=n_embd,
                         n_unmasked=n_unmasked)
    idx = jax.random.randint(kidx, (B, T), 0, vocab_size, dtype=jnp.int32)

    logits, loss = warp_gpt_forward(params, idx, warpkwargs={}, n_head=n_head,
                                    block_size=block_size, n_unmasked=n_unmasked)
    logits = jax.block_until_ready(logits)

    assert logits.shape == (B, T, vocab_size)
    assert bool(jnp.all(jnp.isfinite(logits)))

    # loose check vs f32 reference (kernel uses bf16 matmuls + approx reciprocal)
    ref = jax.block_until_ready(ref_forward(params, idx, n_head=n_head,
                                            n_unmasked=n_unmasked))
    max_err = float(jnp.max(jnp.abs(logits - ref)))
    assert max_err < 1e-2, f"mismatch vs reference: {max_err}"

    print("KERNEL_OK")
</pallas_src>

<mosaic_0001>
module attributes {stable_mosaic.version = 11 : i64} {
  func.func @_stack_kernel(%arg0: i32, %arg1: i32, %arg2: memref<1x8x32xf32, #tpu.memory_space<vmem>>, %arg3: memref<1x1x32xf32, #tpu.memory_space<vmem>>, %arg4: memref<1x1x32xf32, #tpu.memory_space<vmem>>, %arg5: memref<1x32x96xbf16, #tpu.memory_space<vmem>>, %arg6: memref<1x1x96xf32, #tpu.memory_space<vmem>>, %arg7: memref<1x32x32xbf16, #tpu.memory_space<vmem>>, %arg8: memref<1x1x32xf32, #tpu.memory_space<vmem>>, %arg9: memref<1x1x32xf32, #tpu.memory_space<vmem>>, %arg10: memref<1x1x32xf32, #tpu.memory_space<vmem>>, %arg11: memref<1x32x128xbf16, #tpu.memory_space<vmem>>, %arg12: memref<1x1x128xf32, #tpu.memory_space<vmem>>, %arg13: memref<1x128x32xbf16, #tpu.memory_space<vmem>>, %arg14: memref<1x1x32xf32, #tpu.memory_space<vmem>>, %arg15: memref<1x8x32xf32, #tpu.memory_space<vmem>>, %arg16: memref<8x32xf32, #tpu.memory_space<vmem>>) attributes {dimension_semantics = [#tpu.dimension_semantics<parallel>, #tpu.dimension_semantics<arbitrary>], iteration_bounds = array<i64: 2, 2>, scalar_prefetch = 0 : i64, scratch_operands = 1 : i64, tpu.core_type = #tpu.core_type<tc>, window_params = [{transform_indices = @transform_0, window_bounds = array<i64: 1, 8, 32>}, {transform_indices = @transform_1, window_bounds = array<i64: 1, 1, 32>}, {transform_indices = @transform_2, window_bounds = array<i64: 1, 1, 32>}, {transform_indices = @transform_3, window_bounds = array<i64: 1, 32, 96>}, {transform_indices = @transform_4, window_bounds = array<i64: 1, 1, 96>}, {transform_indices = @transform_5, window_bounds = array<i64: 1, 32, 32>}, {transform_indices = @transform_6, window_bounds = array<i64: 1, 1, 32>}, {transform_indices = @transform_7, window_bounds = array<i64: 1, 1, 32>}, {transform_indices = @transform_8, window_bounds = array<i64: 1, 1, 32>}, {transform_indices = @transform_9, window_bounds = array<i64: 1, 32, 128>}, {transform_indices = @transform_10, window_bounds = array<i64: 1, 1, 128>}, {transform_indices = @transform_11, window_bounds = array<i64: 1, 128, 32>}, {transform_indices = @transform_12, window_bounds = array<i64: 1, 1, 32>}, {transform_indices = @transform_13, window_bounds = array<i64: 1, 8, 32>}]} {
    %c0_i32 = arith.constant 0 : i32
    %0 = arith.cmpi eq, %arg1, %c0_i32 : i32
    %1 = arith.extui %0 : i1 to i32
    %c0_i32_0 = arith.constant 0 : i32
    %2 = arith.cmpi ne, %1, %c0_i32_0 : i32
    scf.if %2 {
      %c0_79 = arith.constant 0 : index
      %c0_80 = arith.constant 0 : index
      %c0_81 = arith.constant 0 : index
      %197 = vector.load %arg2[%c0_79, %c0_80, %c0_81] : memref<1x8x32xf32, #tpu.memory_space<vmem>>, vector<1x8x32xf32>
      %198 = vector.shape_cast %197 : vector<1x8x32xf32> to vector<8x32xf32>
      %c0_82 = arith.constant 0 : index
      %c0_83 = arith.constant 0 : index
      %199 = vector.load %arg16[%c0_82, %c0_83] : memref<8x32xf32, #tpu.memory_space<vmem>>, vector<8x32xf32>
      tpu.vector_store %arg16[%c0_82, %c0_83], %198 {strides = array<i32>} : memref<8x32xf32, #tpu.memory_space<vmem>>, vector<8x32xf32>,
    } else {
    }
    %c0 = arith.constant 0 : index
    %c0_1 = arith.constant 0 : index
    %3 = vector.load %arg16[%c0, %c0_1] : memref<8x32xf32, #tpu.memory_space<vmem>>, vector<8x32xf32>
    %c0_2 = arith.constant 0 : index
    %c0_3 = arith.constant 0 : index
    %c0_4 = arith.constant 0 : index
    %4 = vector.load %arg3[%c0_2, %c0_3, %c0_4] : memref<1x1x32xf32, #tpu.memory_space<vmem>>, vector<1x1x32xf32>
    %5 = vector.shape_cast %4 : vector<1x1x32xf32> to vector<1x32xf32>
    %c0_5 = arith.constant 0 : index
    %c0_6 = arith.constant 0 : index
    %c0_7 = arith.constant 0 : index
    %6 = vector.load %arg4[%c0_5, %c0_6, %c0_7] : memref<1x1x32xf32, #tpu.memory_space<vmem>>, vector<1x1x32xf32>
    %7 = vector.shape_cast %6 : vector<1x1x32xf32> to vector<1x32xf32>
    %cst = arith.constant dense<0.000000e+00> : vector<8xf32>
    %8 = vector.multi_reduction <add>, %3, %cst [1] : vector<8x32xf32> to vector<8xf32>
    %9 = vector.shape_cast %8 : vector<8xf32> to vector<8x1xf32>
    %cst_8 = arith.constant 3.200000e+01 : f32
    %10 = vector.broadcast %cst_8 : f32 to vector<8x1xf32>
    %11 = arith.divf %9, %10 : vector<8x1xf32>
    %12 = vector.broadcast %11 : vector<8x1xf32> to vector<8x32xf32>
    %13 = arith.subf %3, %12 : vector<8x32xf32>
    %14 = arith.mulf %13, %13 : vector<8x32xf32>
    %cst_9 = arith.constant dense<0.000000e+00> : vector<8xf32>
    %15 = vector.multi_reduction <add>, %14, %cst_9 [1] : vector<8x32xf32> to vector<8xf32>
    %16 = vector.shape_cast %15 : vector<8xf32> to vector<8x1xf32>
    %cst_10 = arith.constant 3.200000e+01 : f32
    %17 = vector.broadcast %cst_10 : f32 to vector<8x1xf32>
    %18 = arith.divf %16, %17 : vector<8x1xf32>
    %cst_11 = arith.constant 9.99999974E-6 : f32
    %19 = vector.broadcast %cst_11 : f32 to vector<8x1xf32>
    %20 = arith.addf %18, %19 : vector<8x1xf32>
    %21 = math.rsqrt %20 : vector<8x1xf32>
    %22 = vector.broadcast %21 : vector<8x1xf32> to vector<8x32xf32>
    %23 = arith.mulf %13, %22 : vector<8x32xf32>
    %24 = vector.broadcast %5 : vector<1x32xf32> to vector<8x32xf32>
    %25 = arith.mulf %23, %24 : vector<8x32xf32>
    %26 = vector.broadcast %7 : vector<1x32xf32> to vector<8x32xf32>
    %27 = arith.addf %25, %26 : vector<8x32xf32>
    %28 = arith.truncf %27 : vector<8x32xf32> to vector<8x32xbf16>
    %c0_12 = arith.constant 0 : index
    %c0_13 = arith.constant 0 : index
    %c0_14 = arith.constant 0 : index
    %29 = vector.load %arg5[%c0_12, %c0_13, %c0_14] : memref<1x32x96xbf16, #tpu.memory_space<vmem>>, vector<1x32x96xbf16>
    %30 = vector.shape_cast %29 : vector<1x32x96xbf16> to vector<32x96xbf16>
    %cst_15 = arith.constant dense<0.000000e+00> : vector<8x96xf32>
    %31 = tpu.matmul %28, %30, %cst_15 {dimension_numbers = #tpu.dot_dimension_numbers<[1], [0], [0], [1], [0, 0, 1, 1], [], []>} : vector<8x32xbf16>, vector<32x96xbf16>, vector<8x96xf32> -> vector<8x96xf32>
    %c0_16 = arith.constant 0 : index
    %c0_17 = arith.constant 0 : index
    %c0_18 = arith.constant 0 : index
    %32 = vector.load %arg6[%c0_16, %c0_17, %c0_18] : memref<1x1x96xf32, #tpu.memory_space<vmem>>, vector<1x1x96xf32>
    %33 = vector.shape_cast %32 : vector<1x1x96xf32> to vector<1x96xf32>
    %34 = vector.broadcast %33 : vector<1x96xf32> to vector<8x96xf32>
    %35 = arith.addf %31, %34 : vector<8x96xf32>
    %36 = vector.extract_strided_slice %35 {offsets = [0, 0], sizes = [8, 32], strides = [1, 1]} : vector<8x96xf32> to vector<8x32xf32>
    %cst_19 = arith.constant 0.353553385 : f32
    %37 = vector.broadcast %cst_19 : f32 to vector<8x32xf32>
    %38 = arith.mulf %36, %37 : vector<8x32xf32>
    %39 = vector.extract_strided_slice %35 {offsets = [0, 32], sizes = [8, 32], strides = [1, 1]} : vector<8x96xf32> to vector<8x32xf32>
    %40 = vector.extract_strided_slice %35 {offsets = [0, 64], sizes = [8, 32], strides = [1, 1]} : vector<8x96xf32> to vector<8x32xf32>
    %41 = tpu.iota {dimensions = array<i32: 0>} : vector<8x8xi32>
    %42 = tpu.iota {dimensions = array<i32: 1>} : vector<8x8xi32>
    %43 = arith.cmpi sle, %42, %41 : vector<8x8xi32>
    %c4_i32 = arith.constant 4 : i32
    %44 = vector.broadcast %c4_i32 : i32 to vector<8x8xi32>
    %45 = arith.cmpi slt, %41, %44 : vector<8x8xi32>
    %c4_i32_20 = arith.constant 4 : i32
    %46 = vector.broadcast %c4_i32_20 : i32 to vector<8x8xi32>
    %47 = arith.cmpi slt, %42, %46 : vector<8x8xi32>
    %48 = arith.andi %45, %47 : vector<8x8xi1>
    %49 = arith.ori %43, %48 : vector<8x8xi1>
    %50 = vector.extract_strided_slice %38 {offsets = [0, 0], sizes = [8, 8], strides = [1, 1]} : vector<8x32xf32> to vector<8x8xf32>
    %51 = arith.truncf %50 : vector<8x8xf32> to vector<8x8xbf16>
    %52 = vector.extract_strided_slice %39 {offsets = [0, 0], sizes = [8, 8], strides = [1, 1]} : vector<8x32xf32> to vector<8x8xf32>
    %53 = arith.truncf %52 : vector<8x8xf32> to vector<8x8xbf16>
    %54 = vector.extract_strided_slice %40 {offsets = [0, 0], sizes = [8, 8], strides = [1, 1]} : vector<8x32xf32> to vector<8x8xf32>
    %55 = arith.truncf %54 : vector<8x8xf32> to vector<8x8xbf16>
    %cst_21 = arith.constant dense<0.000000e+00> : vector<8x8xf32>
    %56 = tpu.matmul %51, %53, %cst_21 {dimension_numbers = #tpu.dot_dimension_numbers<[1], [1], [0], [0], [0, 0, 1, 0], [], []>} : vector<8x8xbf16>, vector<8x8xbf16>, vector<8x8xf32> -> vector<8x8xf32>
    %cst_22 = arith.constant -1.000000e+30 : f32
    %57 = vector.broadcast %cst_22 : f32 to vector<8x8xf32>
    %58 = arith.select %49, %56, %57 : vector<8x8xi1>, vector<8x8xf32>
    %cst_23 = arith.constant dense<0xFF800000> : vector<8xf32>
    %59 = vector.multi_reduction <maximumf>, %58, %cst_23 [1] : vector<8x8xf32> to vector<8xf32>
    %60 = vector.shape_cast %59 : vector<8xf32> to vector<8x1xf32>
    %61 = vector.broadcast %60 : vector<8x1xf32> to vector<8x8xf32>
    %62 = arith.subf %58, %61 : vector<8x8xf32>
    %63 = math.exp %62 : vector<8x8xf32>
    %cst_24 = arith.constant dense<0.000000e+00> : vector<8xf32>
    %64 = vector.multi_reduction <add>, %63, %cst_24 [1] : vector<8x8xf32> to vector<8xf32>
    %65 = vector.shape_cast %64 : vector<8xf32> to vector<8x1xf32>
    %66 = tpu.reciprocal %65 {approx = true} : vector<8x1xf32> -> vector<8x1xf32>
    %67 = vector.broadcast %66 : vector<8x1xf32> to vector<8x8xf32>
    %68 = arith.mulf %63, %67 : vector<8x8xf32>
    %69 = arith.truncf %68 : vector<8x8xf32> to vector<8x8xbf16>
    %cst_25 = arith.constant dense<0.000000e+00> : vector<8x8xf32>
    %70 = tpu.matmul %69, %55, %cst_25 {dimension_numbers = #tpu.dot_dimension_numbers<[1], [0], [0], [1], [0, 0, 1, 1], [], []>} : vector<8x8xbf16>, vector<8x8xbf16>, vector<8x8xf32> -> vector<8x8xf32>
    %71 = vector.extract_strided_slice %38 {offsets = [0, 8], sizes = [8, 8], strides = [1, 1]} : vector<8x32xf32> to vector<8x8xf32>
    %72 = arith.truncf %71 : vector<8x8xf32> to vector<8x8xbf16>
    %73 = vector.extract_strided_slice %39 {offsets = [0, 8], sizes = [8, 8], strides = [1, 1]} : vector<8x32xf32> to vector<8x8xf32>
    %74 = arith.truncf %73 : vector<8x8xf32> to vector<8x8xbf16>
    %75 = vector.extract_strided_slice %40 {offsets = [0, 8], sizes = [8, 8], strides = [1, 1]} : vector<8x32xf32> to vector<8x8xf32>
    %76 = arith.truncf %75 : vector<8x8xf32> to vector<8x8xbf16>
    %cst_26 = arith.constant dense<0.000000e+00> : vector<8x8xf32>
    %77 = tpu.matmul %72, %74, %cst_26 {dimension_numbers = #tpu.dot_dimension_numbers<[1], [1], [0], [0], [0, 0, 1, 0], [], []>} : vector<8x8xbf16>, vector<8x8xbf16>, vector<8x8xf32> -> vector<8x8xf32>
    %cst_27 = arith.constant -1.000000e+30 : f32
    %78 = vector.broadcast %cst_27 : f32 to vector<8x8xf32>
    %79 = arith.select %49, %77, %78 : vector<8x8xi1>, vector<8x8xf32>
    %cst_28 = arith.constant dense<0xFF800000> : vector<8xf32>
    %80 = vector.multi_reduction <maximumf>, %79, %cst_28 [1] : vector<8x8xf32> to vector<8xf32>
    %81 = vector.shape_cast %80 : vector<8xf32> to vector<8x1xf32>
    %82 = vector.broadcast %81 : vector<8x1xf32> to vector<8x8xf32>
    %83 = arith.subf %79, %82 : vector<8x8xf32>
    %84 = math.exp %83 : vector<8x8xf32>
    %cst_29 = arith.constant dense<0.000000e+00> : vector<8xf32>
    %85 = vector.multi_reduction <add>, %84, %cst_29 [1] : vector<8x8xf32> to vector<8xf32>
    %86 = vector.shape_cast %85 : vector<8xf32> to vector<8x1xf32>
    %87 = tpu.reciprocal %86 {approx = true} : vector<8x1xf32> -> vector<8x1xf32>
    %88 = vector.broadcast %87 : vector<8x1xf32> to vector<8x8xf32>
    %89 = arith.mulf %84, %88 : vector<8x8xf32>
    %90 = arith.truncf %89 : vector<8x8xf32> to vector<8x8xbf16>
    %cst_30 = arith.constant dense<0.000000e+00> : vector<8x8xf32>
    %91 = tpu.matmul %90, %76, %cst_30 {dimension_numbers = #tpu.dot_dimension_numbers<[1], [0], [0], [1], [0, 0, 1, 1], [], []>} : vector<8x8xbf16>, vector<8x8xbf16>, vector<8x8xf32> -> vector<8x8xf32>
    %92 = vector.extract_strided_slice %38 {offsets = [0, 16], sizes = [8, 8], strides = [1, 1]} : vector<8x32xf32> to vector<8x8xf32>
    %93 = arith.truncf %92 : vector<8x8xf32> to vector<8x8xbf16>
    %94 = vector.extract_strided_slice %39 {offsets = [0, 16], sizes = [8, 8], strides = [1, 1]} : vector<8x32xf32> to vector<8x8xf32>
    %95 = arith.truncf %94 : vector<8x8xf32> to vector<8x8xbf16>
    %96 = vector.extract_strided_slice %40 {offsets = [0, 16], sizes = [8, 8], strides = [1, 1]} : vector<8x32xf32> to vector<8x8xf32>
    %97 = arith.truncf %96 : vector<8x8xf32> to vector<8x8xbf16>
    %cst_31 = arith.constant dense<0.000000e+00> : vector<8x8xf32>
    %98 = tpu.matmul %93, %95, %cst_31 {dimension_numbers = #tpu.dot_dimension_numbers<[1], [1], [0], [0], [0, 0, 1, 0], [], []>} : vector<8x8xbf16>, vector<8x8xbf16>, vector<8x8xf32> -> vector<8x8xf32>
    %cst_32 = arith.constant -1.000000e+30 : f32
    %99 = vector.broadcast %cst_32 : f32 to vector<8x8xf32>
    %100 = arith.select %49, %98, %99 : vector<8x8xi1>, vector<8x8xf32>
    %cst_33 = arith.constant dense<0xFF800000> : vector<8xf32>
    %101 = vector.multi_reduction <maximumf>, %100, %cst_33 [1] : vector<8x8xf32> to vector<8xf32>
    %102 = vector.shape_cast %101 : vector<8xf32> to vector<8x1xf32>
    %103 = vector.broadcast %102 : vector<8x1xf32> to vector<8x8xf32>
    %104 = arith.subf %100, %103 : vector<8x8xf32>
    %105 = math.exp %104 : vector<8x8xf32>
    %cst_34 = arith.constant dense<0.000000e+00> : vector<8xf32>
    %106 = vector.multi_reduction <add>, %105, %cst_34 [1] : vector<8x8xf32> to vector<8xf32>
    %107 = vector.shape_cast %106 : vector<8xf32> to vector<8x1xf32>
    %108 = tpu.reciprocal %107 {approx = true} : vector<8x1xf32> -> vector<8x1xf32>
    %109 = vector.broadcast %108 : vector<8x1xf32> to vector<8x8xf32>
    %110 = arith.mulf %105, %109 : vector<8x8xf32>
    %111 = arith.truncf %110 : vector<8x8xf32> to vector<8x8xbf16>
    %cst_35 = arith.constant dense<0.000000e+00> : vector<8x8xf32>
    %112 = tpu.matmul %111, %97, %cst_35 {dimension_numbers = #tpu.dot_dimension_numbers<[1], [0], [0], [1], [0, 0, 1, 1], [], []>} : vector<8x8xbf16>, vector<8x8xbf16>, vector<8x8xf32> -> vector<8x8xf32>
    %113 = vector.extract_strided_slice %38 {offsets = [0, 24], sizes = [8, 8], strides = [1, 1]} : vector<8x32xf32> to vector<8x8xf32>
    %114 = arith.truncf %113 : vector<8x8xf32> to vector<8x8xbf16>
    %115 = vector.extract_strided_slice %39 {offsets = [0, 24], sizes = [8, 8], strides = [1, 1]} : vector<8x32xf32> to vector<8x8xf32>
    %116 = arith.truncf %115 : vector<8x8xf32> to vector<8x8xbf16>
    %117 = vector.extract_strided_slice %40 {offsets = [0, 24], sizes = [8, 8], strides = [1, 1]} : vector<8x32xf32> to vector<8x8xf32>
    %118 = arith.truncf %117 : vector<8x8xf32> to vector<8x8xbf16>
    %cst_36 = arith.constant dense<0.000000e+00> : vector<8x8xf32>
    %119 = tpu.matmul %114, %116, %cst_36 {dimension_numbers = #tpu.dot_dimension_numbers<[1], [1], [0], [0], [0, 0, 1, 0], [], []>} : vector<8x8xbf16>, vector<8x8xbf16>, vector<8x8xf32> -> vector<8x8xf32>
    %cst_37 = arith.constant -1.000000e+30 : f32
    %120 = vector.broadcast %cst_37 : f32 to vector<8x8xf32>
    %121 = arith.select %49, %119, %120 : vector<8x8xi1>, vector<8x8xf32>
    %cst_38 = arith.constant dense<0xFF800000> : vector<8xf32>
    %122 = vector.multi_reduction <maximumf>, %121, %cst_38 [1] : vector<8x8xf32> to vector<8xf32>
    %123 = vector.shape_cast %122 : vector<8xf32> to vector<8x1xf32>
    %124 = vector.broadcast %123 : vector<8x1xf32> to vector<8x8xf32>
    %125 = arith.subf %121, %124 : vector<8x8xf32>
    %126 = math.exp %125 : vector<8x8xf32>
    %cst_39 = arith.constant dense<0.000000e+00> : vector<8xf32>
    %127 = vector.multi_reduction <add>, %126, %cst_39 [1] : vector<8x8xf32> to vector<8xf32>
    %128 = vector.shape_cast %127 : vector<8xf32> to vector<8x1xf32>
    %129 = tpu.reciprocal %128 {approx = true} : vector<8x1xf32> -> vector<8x1xf32>
    %130 = vector.broadcast %129 : vector<8x1xf32> to vector<8x8xf32>
    %131 = arith.mulf %126, %130 : vector<8x8xf32>
    %132 = arith.truncf %131 : vector<8x8xf32> to vector<8x8xbf16>
    %cst_40 = arith.constant dense<0.000000e+00> : vector<8x8xf32>
    %133 = tpu.matmul %132, %118, %cst_40 {dimension_numbers = #tpu.dot_dimension_numbers<[1], [0], [0], [1], [0, 0, 1, 1], [], []>} : vector<8x8xbf16>, vector<8x8xbf16>, vector<8x8xf32> -> vector<8x8xf32>
    %134 = tpu.concatenate %70, %91, %112, %133 in 1 : vector<8x8xf32>, vector<8x8xf32>, vector<8x8xf32>, vector<8x8xf32> -> vector<8x32xf32>
    %135 = arith.truncf %134 : vector<8x32xf32> to vector<8x32xbf16>
    %c0_41 = arith.constant 0 : index
    %c0_42 = arith.constant 0 : index
    %c0_43 = arith.constant 0 : index
    %136 = vector.load %arg7[%c0_41, %c0_42, %c0_43] : memref<1x32x32xbf16, #tpu.memory_space<vmem>>, vector<1x32x32xbf16>
    %137 = vector.shape_cast %136 : vector<1x32x32xbf16> to vector<32x32xbf16>
    %cst_44 = arith.constant dense<0.000000e+00> : vector<8x32xf32>
    %138 = tpu.matmul %135, %137, %cst_44 {dimension_numbers = #tpu.dot_dimension_numbers<[1], [0], [0], [1], [0, 0, 1, 1], [], []>} : vector<8x32xbf16>, vector<32x32xbf16>, vector<8x32xf32> -> vector<8x32xf32>
    %c0_45 = arith.constant 0 : index
    %c0_46 = arith.constant 0 : index
    %c0_47 = arith.constant 0 : index
    %139 = vector.load %arg8[%c0_45, %c0_46, %c0_47] : memref<1x1x32xf32, #tpu.memory_space<vmem>>, vector<1x1x32xf32>
    %140 = vector.shape_cast %139 : vector<1x1x32xf32> to vector<1x32xf32>
    %141 = vector.broadcast %140 : vector<1x32xf32> to vector<8x32xf32>
    %142 = arith.addf %138, %141 : vector<8x32xf32>
    %143 = arith.addf %3, %142 : vector<8x32xf32>
    %c0_48 = arith.constant 0 : index
    %c0_49 = arith.constant 0 : index
    %c0_50 = arith.constant 0 : index
    %144 = vector.load %arg9[%c0_48, %c0_49, %c0_50] : memref<1x1x32xf32, #tpu.memory_space<vmem>>, vector<1x1x32xf32>
    %145 = vector.shape_cast %144 : vector<1x1x32xf32> to vector<1x32xf32>
    %c0_51 = arith.constant 0 : index
    %c0_52 = arith.constant 0 : index
    %c0_53 = arith.constant 0 : index
    %146 = vector.load %arg10[%c0_51, %c0_52, %c0_53] : memref<1x1x32xf32, #tpu.memory_space<vmem>>, vector<1x1x32xf32>
    %147 = vector.shape_cast %146 : vector<1x1x32xf32> to vector<1x32xf32>
    %cst_54 = arith.constant dense<0.000000e+00> : vector<8xf32>
    %148 = vector.multi_reduction <add>, %143, %cst_54 [1] : vector<8x32xf32> to vector<8xf32>
    %149 = vector.shape_cast %148 : vector<8xf32> to vector<8x1xf32>
    %cst_55 = arith.constant 3.200000e+01 : f32
    %150 = vector.broadcast %cst_55 : f32 to vector<8x1xf32>
    %151 = arith.divf %149, %150 : vector<8x1xf32>
    %152 = vector.broadcast %151 : vector<8x1xf32> to vector<8x32xf32>
    %153 = arith.subf %143, %152 : vector<8x32xf32>
    %154 = arith.mulf %153, %153 : vector<8x32xf32>
    %cst_56 = arith.constant dense<0.000000e+00> : vector<8xf32>
    %155 = vector.multi_reduction <add>, %154, %cst_56 [1] : vector<8x32xf32> to vector<8xf32>
    %156 = vector.shape_cast %155 : vector<8xf32> to vector<8x1xf32>
    %cst_57 = arith.constant 3.200000e+01 : f32
    %157 = vector.broadcast %cst_57 : f32 to vector<8x1xf32>
    %158 = arith.divf %156, %157 : vector<8x1xf32>
    %cst_58 = arith.constant 9.99999974E-6 : f32
    %159 = vector.broadcast %cst_58 : f32 to vector<8x1xf32>
    %160 = arith.addf %158, %159 : vector<8x1xf32>
    %161 = math.rsqrt %160 : vector<8x1xf32>
    %162 = vector.broadcast %161 : vector<8x1xf32> to vector<8x32xf32>
    %163 = arith.mulf %153, %162 : vector<8x32xf32>
    %164 = vector.broadcast %145 : vector<1x32xf32> to vector<8x32xf32>
    %165 = arith.mulf %163, %164 : vector<8x32xf32>
    %166 = vector.broadcast %147 : vector<1x32xf32> to vector<8x32xf32>
    %167 = arith.addf %165, %166 : vector<8x32xf32>
    %168 = arith.truncf %167 : vector<8x32xf32> to vector<8x32xbf16>
    %c0_59 = arith.constant 0 : index
    %c0_60 = arith.constant 0 : index
    %c0_61 = arith.constant 0 : index
    %169 = vector.load %arg11[%c0_59, %c0_60, %c0_61] : memref<1x32x128xbf16, #tpu.memory_space<vmem>>, vector<1x32x128xbf16>
    %170 = vector.shape_cast %169 : vector<1x32x128xbf16> to vector<32x128xbf16>
    %cst_62 = arith.constant dense<0.000000e+00> : vector<8x128xf32>
    %171 = tpu.matmul %168, %170, %cst_62 {dimension_numbers = #tpu.dot_dimension_numbers<[1], [0], [0], [1], [0, 0, 1, 1], [], []>} : vector<8x32xbf16>, vector<32x128xbf16>, vector<8x128xf32> -> vector<8x128xf32>
    %c0_63 = arith.constant 0 : index
    %c0_64 = arith.constant 0 : index
    %c0_65 = arith.constant 0 : index
    %172 = vector.load %arg12[%c0_63, %c0_64, %c0_65] : memref<1x1x128xf32, #tpu.memory_space<vmem>>, vector<1x1x128xf32>
    %173 = vector.shape_cast %172 : vector<1x1x128xf32> to vector<1x128xf32>
    %174 = vector.broadcast %173 : vector<1x128xf32> to vector<8x128xf32>
    %175 = arith.addf %171, %174 : vector<8x128xf32>
    %cst_66 = arith.constant 5.000000e-01 : f32
    %176 = vector.broadcast %cst_66 : f32 to vector<8x128xf32>
    %177 = arith.mulf %176, %175 : vector<8x128xf32>
    %cst_67 = arith.constant 1.41421354 : f32
    %178 = vector.broadcast %cst_67 : f32 to vector<8x128xf32>
    %179 = arith.divf %175, %178 : vector<8x128xf32>
    %180 = math.erf %179 : vector<8x128xf32>
    %cst_68 = arith.constant 1.000000e+00 : f32
    %181 = vector.broadcast %cst_68 : f32 to vector<8x128xf32>
    %182 = arith.addf %181, %180 : vector<8x128xf32>
    %183 = arith.mulf %177, %182 : vector<8x128xf32>
    %184 = arith.truncf %183 : vector<8x128xf32> to vector<8x128xbf16>
    %c0_69 = arith.constant 0 : index
    %c0_70 = arith.constant 0 : index
    %c0_71 = arith.constant 0 : index
    %185 = vector.load %arg13[%c0_69, %c0_70, %c0_71] : memref<1x128x32xbf16, #tpu.memory_space<vmem>>, vector<1x128x32xbf16>
    %186 = vector.shape_cast %185 : vector<1x128x32xbf16> to vector<128x32xbf16>
    %cst_72 = arith.constant dense<0.000000e+00> : vector<8x32xf32>
    %187 = tpu.matmul %184, %186, %cst_72 {dimension_numbers = #tpu.dot_dimension_numbers<[1], [0], [0], [1], [0, 0, 1, 1], [], []>} : vector<8x128xbf16>, vector<128x32xbf16>, vector<8x32xf32> -> vector<8x32xf32>
    %c0_73 = arith.constant 0 : index
    %c0_74 = arith.constant 0 : index
    %c0_75 = arith.constant 0 : index
    %188 = vector.load %arg14[%c0_73, %c0_74, %c0_75] : memref<1x1x32xf32, #tpu.memory_space<vmem>>, vector<1x1x32xf32>
    %189 = vector.shape_cast %188 : vector<1x1x32xf32> to vector<1x32xf32>
    %190 = vector.broadcast %189 : vector<1x32xf32> to vector<8x32xf32>
    %191 = arith.addf %187, %190 : vector<8x32xf32>
    %192 = arith.addf %143, %191 : vector<8x32xf32>
    %c0_76 = arith.constant 0 : index
    %c0_77 = arith.constant 0 : index
    %193 = vector.load %arg16[%c0_76, %c0_77] : memref<8x32xf32, #tpu.memory_space<vmem>>, vector<8x32xf32>
    tpu.vector_store %arg16[%c0_76, %c0_77], %192 {strides = array<i32>} : memref<8x32xf32, #tpu.memory_space<vmem>>, vector<8x32xf32>,
    %c1_i32 = arith.constant 1 : i32
    %194 = arith.cmpi eq, %arg1, %c1_i32 : i32
    %195 = arith.extui %194 : i1 to i32
    %c0_i32_78 = arith.constant 0 : i32
    %196 = arith.cmpi ne, %195, %c0_i32_78 : i32
    scf.if %196 {
      %c0_79 = arith.constant 0 : index
      %c0_80 = arith.constant 0 : index
      %c0_81 = arith.constant 0 : index
      %197 = vector.load %arg15[%c0_79, %c0_80, %c0_81] : memref<1x8x32xf32, #tpu.memory_space<vmem>>, vector<1x8x32xf32>
      %198 = vector.shape_cast %197 : vector<1x8x32xf32> to vector<8x32xf32>
      %199 = vector.shape_cast %192 : vector<8x32xf32> to vector<1x8x32xf32>
      tpu.vector_store %arg15[%c0_79, %c0_80, %c0_81], %199 {strides = array<i32>} : memref<1x8x32xf32, #tpu.memory_space<vmem>>, vector<1x8x32xf32>,
    } else {
    }
    return
  }
  func.func @transform_0(%arg0: i32, %arg1: i32) -> (i32, i32, i32) {
    %c0_i32 = arith.constant 0 : i32
    %c0_i32_0 = arith.constant 0 : i32
    %c0_i32_1 = arith.constant 0 : i32
    return %arg0, %c0_i32, %c0_i32_0 : i32, i32, i32
  }
  func.func @transform_1(%arg0: i32, %arg1: i32) -> (i32, i32, i32) {
    %c0_i32 = arith.constant 0 : i32
    %c0_i32_0 = arith.constant 0 : i32
    %c0_i32_1 = arith.constant 0 : i32
    return %arg1, %c0_i32, %c0_i32_0 : i32, i32, i32
  }
  func.func @transform_2(%arg0: i32, %arg1: i32) -> (i32, i32, i32) {
    %c0_i32 = arith.constant 0 : i32
    %c0_i32_0 = arith.constant 0 : i32
    %c0_i32_1 = arith.constant 0 : i32
    return %arg1, %c0_i32, %c0_i32_0 : i32, i32, i32
  }
  func.func @transform_3(%arg0: i32, %arg1: i32) -> (i32, i32, i32) {
    %c0_i32 = arith.constant 0 : i32
    %c0_i32_0 = arith.constant 0 : i32
    %c0_i32_1 = arith.constant 0 : i32
    return %arg1, %c0_i32, %c0_i32_0 : i32, i32, i32
  }
  func.func @transform_4(%arg0: i32, %arg1: i32) -> (i32, i32, i32) {
    %c0_i32 = arith.constant 0 : i32
    %c0_i32_0 = arith.constant 0 : i32
    %c0_i32_1 = arith.constant 0 : i32
    return %arg1, %c0_i32, %c0_i32_0 : i32, i32, i32
  }
  func.func @transform_5(%arg0: i32, %arg1: i32) -> (i32, i32, i32) {
    %c0_i32 = arith.constant 0 : i32
    %c0_i32_0 = arith.constant 0 : i32
    %c0_i32_1 = arith.constant 0 : i32
    return %arg1, %c0_i32, %c0_i32_0 : i32, i32, i32
  }
  func.func @transform_6(%arg0: i32, %arg1: i32) -> (i32, i32, i32) {
    %c0_i32 = arith.constant 0 : i32
    %c0_i32_0 = arith.constant 0 : i32
    %c0_i32_1 = arith.constant 0 : i32
    return %arg1, %c0_i32, %c0_i32_0 : i32, i32, i32
  }
  func.func @transform_7(%arg0: i32, %arg1: i32) -> (i32, i32, i32) {
    %c0_i32 = arith.constant 0 : i32
    %c0_i32_0 = arith.constant 0 : i32
    %c0_i32_1 = arith.constant 0 : i32
    return %arg1, %c0_i32, %c0_i32_0 : i32, i32, i32
  }
  func.func @transform_8(%arg0: i32, %arg1: i32) -> (i32, i32, i32) {
    %c0_i32 = arith.constant 0 : i32
    %c0_i32_0 = arith.constant 0 : i32
    %c0_i32_1 = arith.constant 0 : i32
    return %arg1, %c0_i32, %c0_i32_0 : i32, i32, i32
  }
  func.func @transform_9(%arg0: i32, %arg1: i32) -> (i32, i32, i32) {
    %c0_i32 = arith.constant 0 : i32
    %c0_i32_0 = arith.constant 0 : i32
    %c0_i32_1 = arith.constant 0 : i32
    return %arg1, %c0_i32, %c0_i32_0 : i32, i32, i32
  }
  func.func @transform_10(%arg0: i32, %arg1: i32) -> (i32, i32, i32) {
    %c0_i32 = arith.constant 0 : i32
    %c0_i32_0 = arith.constant 0 : i32
    %c0_i32_1 = arith.constant 0 : i32
    return %arg1, %c0_i32, %c0_i32_0 : i32, i32, i32
  }
  func.func @transform_11(%arg0: i32, %arg1: i32) -> (i32, i32, i32) {
    %c0_i32 = arith.constant 0 : i32
    %c0_i32_0 = arith.constant 0 : i32
    %c0_i32_1 = arith.constant 0 : i32
    return %arg1, %c0_i32, %c0_i32_0 : i32, i32, i32
  }
  func.func @transform_12(%arg0: i32, %arg1: i32) -> (i32, i32, i32) {
    %c0_i32 = arith.constant 0 : i32
    %c0_i32_0 = arith.constant 0 : i32
    %c0_i32_1 = arith.constant 0 : i32
    return %arg1, %c0_i32, %c0_i32_0 : i32, i32, i32
  }
  func.func @transform_13(%arg0: i32, %arg1: i32) -> (i32, i32, i32) {
    %c0_i32 = arith.constant 0 : i32
    %c0_i32_0 = arith.constant 0 : i32
    %c0_i32_1 = arith.constant 0 : i32
    return %arg0, %c0_i32, %c0_i32_0 : i32, i32, i32
  }
}

</mosaic_0001>

<bundles_post_ra>
// kernel: tpu_custom_call.1
= control target key start
LH: loop header
LB: loop body
LE: loop exit
PB: predicated region body
PF: predicated region fallthrough
CT: control target
= control target key end

     0   :  { %s2568_s0 = inlined_call_operand.vmem [shape: f32[2,8,32], index: 0, kind: input, shape index: {}]   ;;  %s2569_s1 = inlined_call_operand.vmem [shape: f32[2,1,32], index: 1, kind: input, shape index: {}]   ;;  %s2570_s2 = inlined_call_operand.vmem [shape: f32[2,1,32], index: 2, kind: input, shape index: {}]   ;;  %s2571_s3 = inlined_call_operand.vmem [shape: bf16[2,32,96], index: 3, kind: input, shape index: {}]   ;;  %s2572_s4 = inlined_call_operand.vmem [shape: f32[2,1,96], index: 4, kind: input, shape index: {}]   ;;  %s2573_s5 = inlined_call_operand.vmem [shape: bf16[2,32,32], index: 5, kind: input, shape index: {}]   ;;  %s2574_s6 = inlined_call_operand.vmem [shape: f32[2,1,32], index: 6, kind: input, shape index: {}]   ;;  %s2575_s7 = inlined_call_operand.vmem [shape: f32[2,1,32], index: 7, kind: input, shape index: {}]   ;;  %s2576_s8 = inlined_call_operand.vmem [shape: f32[2,1,32], index: 8, kind: input, shape index: {}]   ;;  %s2577_s9 = inlined_call_operand.vmem [shape: bf16[2,32,128], index: 9, kind: input, shape index: {}]   ;;  %s2578_s10 = inlined_call_operand.vmem [shape: f32[2,1,128], index: 10, kind: input, shape index: {}]   ;;  %s2579_s11 = inlined_call_operand.vmem [shape: bf16[2,128,32], index: 11, kind: input, shape index: {}]   ;;  %s2580_s12 = inlined_call_operand.vmem [shape: f32[2,1,32], index: 12, kind: input, shape index: {}]   ;;  %s2581_s13 = inlined_call_operand.hbm [shape: f32[2,8,32], index: 13, kind: output, shape index: {}]  }
   0x1   :  { %2597 = sst [smem:[#allocation19_spill]] %s2568_s0 }
   0x2   :  { %2598 = sst [smem:[#allocation20_spill]] %s2570_s2 }
   0x3   :  { %2599 = sst [smem:[#allocation21_spill]] %s2571_s3 }
   0x4   :  { %2600 = sst [smem:[#allocation22_spill]] %s2573_s5 }
   0x5   :  { %2601 = sst [smem:[#allocation23_spill]] %s2581_s13 }
   0x6   :  { %18 = vsyncpa [#allocation4], 0 }
   0x7   :  { %20 = vsyncpa [#allocation4 + $0x1], 0  ;;  %s2205_s25 = smov 0   ;;  %s2207_s26 = smov 0  }
   0x8   :  { %s2209_s27 = smov 0   ;;  %s2211_s28 = smov 0  }
   0x9   :  { %s2213_s29 = smov 0   ;;  %s2215_s30 = smov 0  }
   0xa   :  { %s2217_s14 = smov 0   ;;  %s2219_s15 = smov 0  }
   0xb LB: > { %2602 = sst [smem:[#allocation6_spill]] %s2088_s25  ;;  %s1715_s16 = sadd.s32 4294967295, %s2116_s15   ;;  %s2116_s15 = sphi %s2219_s15, %s26_s15   ;;  %s2112_s14 = sphi %s2217_s14, %s2646_s14   ;;  %s2108_s30 = sphi %s2215_s30, %s2645_s30   ;;  %s2104_s29 = sphi %s2213_s29, %s2644_s29   ;;  %s2100_s28 = sphi %s2211_s28, %s2643_s28   ;;  %s2096_s27 = sphi %s2209_s27, %s2642_s27   ;;  %s2092_s26 = sphi %s2207_s26, %s2641_s26   ;;  %s2088_s25 = sphi %s2205_s25, %s2640_s25  }
   0xc   : > { %2603 = sst [smem:[#allocation7_spill]] %s2092_s26  ;;  %s1716_s17 = sadd.s32 4294967294, %s2116_s15  }
   0xd   : > { %2604 = sst [smem:[#allocation8_spill]] %s2096_s27  ;;  %s35_s18 = sadd.s32 1, %s2108_s30 }
   0xe   : > { %2605 = sst [smem:[#allocation9_spill]] %s2100_s28  ;;  %p36_p0 = scmp.ge.s32.totalorder %s35_s18, 2 }
   0xf   : > { %2606 = sst [smem:[#allocation10_spill]] %s2104_s29  ;;  %s38_s19 = sadd.s32 1, %s2112_s14 }
  0x10   : > { %2607 = sst [smem:[#allocation11_spill]] %s2108_s30  ;;  %p393_p1 = scmp.ne.s32.totalorder %s2096_s27, %s2092_s26 }
  0x11   : > { %2608 = sst [smem:[#allocation12_spill]] %s2112_s14  ;;  %p394_p2 = scmp.eq.s32.totalorder %s1715_s16, 3 }
  0x12   : > { %2609 = sst [smem:[#allocation13_spill]] %s2116_s15  ;;  %s2648_s18 = smov (%p36_p0, %s35_s18), 0 }
  0x13   : > { %2610 = sst [smem:[#allocation14_spill]] %s2648_s18  ;;  %s2650_s19 = smov (!%p36_p0, %s38_s19), %s2112_s14 }
  0x14   : > { %p2254_p3 = por %p394_p2, %p393_p1  ;;  %p399_p4 = scmp.ne.s32.totalorder %s2092_s26, %s2088_s25 }
  0x15   : > { %p40_p5 = scmp.ge.s32.totalorder %s2650_s19, 2  ;;  %p400_p6 = scmp.eq.s32.totalorder %s1716_s17, 3 }
  0x16   : > { %s2611_s20 = scalar_select %p2254_p3, 1, 0 }
  0x17   : > { %p1719_p7 = scmp.ge.s32.totalorder %s2116_s15, 1  ;;  %p505_p8 = scmp.lt.s32.totalorder %s2116_s15, 5 }
  0x18   : > { %2612 = sst [smem:[#allocation15_spill]] %s2611_s20  ;;  %s2652_s19 = smov (%p40_p5, %s2650_s19), 0 }
  0x19   : > { %2613 = sst [smem:[#allocation16_spill]] %s2652_s19  ;;  %p2264_p9 = por %p400_p6, %p399_p4 }
  0x1a   : > { %p506_p10 = pnand %p1719_p7, %p505_p8  ;;  %s380_s22 = ssub.s32 %s2112_s14, %s2652_s19 }
  0x1b   : > { %s2614_s21 = scalar_select %p2264_p9, 1, 0 }
  0x1c   : > { %s383_s23 = sadd.s32 1, %s2096_s27  ;;  %p381_p11 = scmp.eq.s32.totalorder %s380_s22, 0 }
  0x1d   : > { %2615 = sst [smem:[#allocation17_spill]] %s2614_s21  ;;  %509 = sbr.rel (%p506_p10) target bundleno = 2635 (0xa4b), region = 72 }
  0x1e   : > { %s2272_s24 = scalar_select %p381_p11, %s2096_s27, %s383_s23  }
  0x1f   : > { %s2584_s16 = sand.u32 (!%p506_p10), 1, %s2092_s26   ;;  %p592_p12 = scmp.lt.s32.totalorder (!%p506_p10), %s2104_s29, 1 }
  0x20   : > { %2616 = sst [smem:[#allocation18_spill]] %s2272_s24  ;;  %s2278_s17 = sshll.u32 (!%p506_p10), %s2584_s16, 3 }
  0x21   : > { %p596_p13 = scmp.lt.s32.totalorder (!%p506_p10), %s2100_s28, 1  ;;  %s2617_s0 = sld [smem:[#allocation19_spill]] (!%p506_p10) }
  0x22   : > { %s2619_s3 = sld [smem:[#allocation21_spill]] (!%p506_p10)  ;;  %s2620_s5 = sld [smem:[#allocation22_spill]] (!%p506_p10) }
  0x23   : > { %s591_s26 = scalar_lea.vmem (!%p506_p10), [#allocation3], %s2278_s17  ;;  %s2621_s20 = sld [smem:[#allocation9_spill]] (!%p506_p10) }
  0x24   : > { %s593_s18 = scalar_select %p592_p12, %s2104_s29, 1 }
  0x25   : > { %s2283_s30 = scalar_select %p596_p13, %s2100_s28, 1 }
  0x26   : > { %s1721_s22 = sshll.u32 %s593_s18, 3 }
  0x27   : > { %s595_s16 = scalar_lea.vmem %s2617_s0, %s1721_s22  ;;  %s1769_s13 = sshll.u32 %s2283_s30, 4 }
  0x28   : > { %s2300_s29 = scalar_lea.vmem %s2619_s3, %s1769_s13  ;;  %s2309_s0 = scalar_lea.vmem %s2620_s5, %s1769_s13 }
  0x29   : > { %s623_s3 = scalar_lea.vmem %s2576_s8, %s2283_s30  ;;  %s2326_s18 = scalar_lea.vmem %s2577_s9, %s1769_s13 }
  0x2a   : > { %s631_s19 = scalar_lea.vmem %s2578_s10, %s2283_s30  ;;  %s1772_s5 = sshll.u32 %s2283_s30, 6 }
  0x2b   : > { %s639_s25 = scalar_lea.vmem %s2580_s12, %s2283_s30  ;;  %s2340_s27 = scalar_lea.vmem %s2579_s11, %s1772_s5 }
  0x2c   : > { %p1730_p0 = scmp.ne.s32.totalorder %s2621_s20, 0 }
  0x2d   : > { %v645_v0 = vld [vmem:[%s595_s16] sm:$0xff] (!%p1730_p0)  ;;  %vm646_vm0 = vcmask (!%p1730_p0), 261120  }
  0x2e   : > { %644 = sbr.rel (%p1730_p0) target bundleno = 53 (0x35), region = 76  ;;  %647 = vst.msk [vmem:[#allocation2] sm:$0xff] (!%p1730_p0), %vm646_vm0, %v645_v0 }
  0x35 PF: > { %v2344_v1 = vld [vmem:[#allocation2] sm:$0xff]  ;;  %vm651_vm1 = vcmask 261120   ;;  %v2118_v9 = vmov 0.0   ;;  %vm2119_vm2 = vmmov 0   ;;  %v1987_v10 = vld [vmem:[%s2300_s29 + $0x8] sm:$0xff]   ;;  %s2622_s13 = scalar_lea.vmem %s2569_s1, %s2283_s30  ;;  %s2623_s28 = sld [smem:[#allocation20_spill]]  ;;  %v748_v41 = vlaneseq }
  0x36   : > { %v652_v2 = vsel %vm651_vm1, %v2344_v1, 0.0  ;;  %v1986_v8 = vld [vmem:[%s2300_s29] sm:$0xff]   ;;  %1807 = vmatprep.subr.bf16.mxu0 %v2118_v9  ;;  %1811 = vmatprep.mubr.msk.bf16.mxu0 %vm2119_vm2, %v2118_v9  ;;  %s2625_s24 = scalar_lea.vmem %s2572_s4, %s2283_s30  ;;  %s2120_s15 = smov 96   ;;  %vm762_vm3 = vcmask 64512   ;;  %vm827_vm9 = vcmask 1043456   ;;  %vm1218_vm10 = vcmask 130048  }
  0x37   : > { %653 = vadd.xlane.f32.xlu0 %v652_v2  ;;  %1808 = vmatpush3.bf16.msra.mxu0 %v1986_v8  ;;  %v1731_v15 = vld [vmem:[%s2622_s13] ss:$0 sm:$0xff]  ;;  %s2121_s21 = smov 120   ;;  %s2122_s20 = smov 88   ;;  %v749_v42 = vshrl.u32 %v748_v41, 7  ;;  %v751_v43 = vand.u32 127, %v748_v41 }
  0x38   : > { %1827 = vmatprep.subr.bf16.mxu1 %v2118_v9  ;;  %1809 = vmatprep.subr.bf16.mxu0 %v2118_v9  ;;  %v1733_v21 = vld [vmem:[%s2625_s24] ss:$0 sm:$0xff]  ;;  %s2123_s2 = smov 80   ;;  %s2124_s5 = smov 112   ;;  %vm1220_vm11 = vcmask 195584  }
  0x39   : > { %1829 = vmatprep.mubr.msk.bf16.mxu1 %vm2119_vm2, %v2118_v9  ;;  %s2125_s13 = smov 72   ;;  %s2126_s29 = smov 104   ;;  %vm753_vm4 = vcmp.lt.s32.totalorder %v749_v42, 4  ;;  %vm754_vm5 = vcmp.lt.s32.totalorder %v751_v43, 4  ;;  %vm752_vm6 = vcmp.le.s32.totalorder %v751_v43, %v749_v42 }
  0x3a   : > { %vm755_vm7 = vmand %vm753_vm4, %vm754_vm5  ;;  %s2127_s16 = smov 64   ;;  %s2130_s22 = smov 40  }
  0x3b   : > { %1810 = vmatpush3.bf16.msra.mxu0 %v1987_v10  ;;  %s2624_s23 = scalar_lea.vmem %s2623_s28, %s2283_s30  ;;  %vm2404_vm8 = vmor %vm752_vm6, %vm755_vm7  ;;  %s2128_s28 = smov 56  }
  0x3c   : > { %1815 = vmatprep.subr.bf16.mxu0 %v2118_v9  ;;  %v1732_v17 = vld [vmem:[%s2624_s23] ss:$0 sm:$0xff]  ;;  %s2129_s23 = smov 48   ;;  %s2131_s14 = smov 8  }
  0x3d   : > { %s2132_s24 = smov 16  }
  0xc4   : > { %v654_v3 = vpop.xlane.xlu0 %653 }
  0xc5   : > { %v656_v4 = vmul.f32 0.03125, %v654_v3 }
  0xc7   : > { %v657_v5 = vsub.f32 %v2344_v1, %v656_v4 }
  0xc9   : > { %v658_v6 = vmul.f32 %v657_v5, %v657_v5 }
  0xcb   : > { %v659_v7 = vsel %vm651_vm1, %v658_v6, 0.0 }
  0xcc   : > { %660 = vadd.xlane.f32.xlu0 %v659_v7 }
 0x159   : > { %v661_v11 = vpop.xlane.xlu0 %660 }
 0x15a   : > { %v662_v12 = vmul.f32 0.03125, %v661_v11 }
 0x15c   : > { %v663_v13 = vadd.f32 1e-05, %v662_v12 }
 0x15e   : > { %2000 = vrsqrt.f32 %v663_v13 }
 0x168   : > { %v2001_v14 = vpop.eup %2000 }
 0x169   : > { %v665_v16 = vmul.f32 %v2001_v14, %v657_v5 }
 0x16b   : > { %v672_v18 = vmul.f32 %v1731_v15, %v665_v16 }
 0x16d   : > { %v679_v19 = vadd.f32 %v1732_v17, %v672_v18 }
 0x16f   : > { %v680_v20 = vpack.c.bf16 %v679_v19, %v679_v19 }
 0x171   : > { %1812 = vmatmul.mubr.msk.bf16.vlgmr.msra.gmra.mrb[0].mxu0 %vm651_vm1, %v680_v20 }
 0x172   : > { %1817 = vmatprep.mubr.msk.bf16.mxu0 %vm2119_vm2, %v2118_v9 }
 0x244   : > { %v741_v22 = vpop.f32.mrb[0].mxu0 }
 0x245   : > { %v742_v23 = vadd.f32 %v1733_v21, %v741_v22  ;;  %v1813_v24 = vpop.f32.mrb[1].mxu0 }
 0x246   : > { %v744_v25 = vpop.f32.mrb[2].mxu0 }
 0x247   : > { %v747_v26 = vmul.f32 0.35355338, %v742_v23  ;;  %v2378_v27 = vpack.c.bf16 %v742_v23, %v742_v23  ;;  %v1814_v28 = vpop.f32.mrb[3].mxu0 }
 0x249   : > { %v757_v29 = vpack.c.bf16 %v747_v26, %v747_v26  ;;  %760 = vrot.lane.b32.xlu1 %v2378_v27, %s2120_s15  ;;  %s2133_s15 = smov 24  }
 0x24b   : > { %872 = vrot.lane.b32.xlu0 %v757_v29, %s2121_s21 }
 0x24d   : > { %874 = vrot.lane.b32.xlu1 %v2378_v27, %s2122_s20  ;;  %s2628_s20 = scalar_lea.vmem %s2574_s6, %s2283_s30 }
 0x251   : > { %985 = vrot.lane.b32.xlu1 %v2378_v27, %s2123_s2 }
 0x255   : > { %983 = vrot.lane.b32.xlu1 %v757_v29, %s2124_s5  ;;  %s2629_s5 = scalar_lea.vmem %s2575_s7, %s2283_s30 }
 0x259   : > { %1096 = vrot.lane.b32.xlu1 %v2378_v27, %s2125_s13 }
 0x25d   : > { %1094 = vrot.lane.b32.xlu1 %v757_v29, %s2126_s29 }
 0x2bb   : > { %v761_v30 = vpop.permute.xlu1 %760 }
 0x2bc   : > { %v767_v31 = vsel %vm762_vm3, %v761_v30, 0 }
 0x2bd   : > { %1816 = vmatpush3.bf16.xpose.msra.mxu0 %v767_v31  ;;  %v873_v35 = vpop.permute.xlu0 %872 }
 0x2be   : > { %1821 = vmatprep.subr.bf16.mxu0 %v2118_v9 }
 0x2bf   : > { %v875_v32 = vpop.permute.xlu1 %874 }
 0x2c0   : > { %v880_v33 = vsel %vm762_vm3, %v875_v32, 0 }
 0x2c1   : > { %1828 = vmatpush3.bf16.xpose.msra.mxu1 %v880_v33 }
 0x2c2   : > { %1839 = vmatprep.subr.bf16.mxu1 %v2118_v9 }
 0x2c3   : > { %v986_v34 = vpop.permute.xlu1 %985 }
 0x2c4   : > { %1818 = vmatmul.mubr.msk.bf16.vlgmr.msra.gmra.mrb[4].mxu0 %vm762_vm3, %v757_v29  ;;  %v991_v37 = vsel %vm762_vm3, %v986_v34, 0 }
 0x2c5   : > { %1823 = vmatprep.mubr.msk.bf16.mxu0 %vm2119_vm2, %v2118_v9 }
 0x2c7   : > { %v984_v36 = vpop.permute.xlu1 %983 }
 0x2c8   : > { %1830 = vmatmul.mubr.msk.bf16.vlgmr.msra.gmra.mrb[0].mxu1 %vm762_vm3, %v873_v35 }
 0x2c9   : > { %1840 = vmatpush3.bf16.xpose.msra.mxu1 %v991_v37  ;;  %1841 = vmatprep.mubr.msk.bf16.mxu1 %vm2119_vm2, %v2118_v9 }
 0x2ca   : > { %1851 = vmatprep.subr.bf16.mxu1 %v2118_v9 }
 0x2cb   : > { %v1097_v38 = vpop.permute.xlu1 %1096 }
 0x2cc   : > { %v1102_v39 = vsel %vm762_vm3, %v1097_v38, 0 }
 0x2cf   : > { %v1095_v40 = vpop.permute.xlu1 %1094 }
 0x2d0   : > { %1842 = vmatmul.mubr.msk.bf16.vlgmr.msra.gmra.mrb[4].mxu1 %vm762_vm3, %v984_v36 }
 0x2d1   : > { %1852 = vmatpush3.bf16.xpose.msra.mxu1 %v1102_v39  ;;  %1853 = vmatprep.mubr.msk.bf16.mxu1 %vm2119_vm2, %v2118_v9 }
 0x2d2   : > { %1863 = vmatprep.subr.bf16.mxu1 %v2118_v9 }
 0x2d8   : > { %1854 = vmatmul.mubr.msk.bf16.vlgmr.msra.gmra.mrb[8].mxu1 %vm762_vm3, %v1095_v40 }
 0x2d9   : > { %1867 = vmatprep.mubr.msk.bf16.mxu1 %vm2119_vm2, %v2118_v9 }
 0x397   : > { %v803_v45 = vpop.f32.mrb[4].mxu0 }
 0x398   : > { %v809_v46 = vsel %vm2404_vm8, %v803_v45, -1e+30  ;;  %v1819_v47 = vpop.f32.mrb[5].mxu0 }
 0x399   : > { %v806_v48 = vpop.f32.mrb[6].mxu0  ;;  %v810_v49 = vsel %vm762_vm3, %v809_v46, -inf }
 0x39a   : > { %811 = vmax.xlane.f32.xlu1 %v810_v49  ;;  %v1820_v50 = vpop.f32.mrb[7].mxu0 }
 0x39b   : > { %v916_v51 = vpop.f32.mrb[0].mxu1 }
 0x39c   : > { %v922_v52 = vsel %vm2404_vm8, %v916_v51, -1e+30  ;;  %v1831_v53 = vpop.f32.mrb[1].mxu1 }
 0x39d   : > { %v919_v54 = vpop.f32.mrb[2].mxu1  ;;  %v923_v55 = vsel %vm762_vm3, %v922_v52, -inf }
 0x39e   : > { %924 = vmax.xlane.f32.xlu0 %v923_v55  ;;  %v1832_v56 = vpop.f32.mrb[3].mxu1 }
 0x3a3   : > { %v1027_v57 = vpop.f32.mrb[4].mxu1 }
 0x3a4   : > { %v1033_v58 = vsel %vm2404_vm8, %v1027_v57, -1e+30  ;;  %v1843_v59 = vpop.f32.mrb[5].mxu1 }
 0x3a5   : > { %v1030_v60 = vpop.f32.mrb[6].mxu1  ;;  %v1034_v61 = vsel %vm762_vm3, %v1033_v58, -inf  ;;  %v1988_v59 = vld [vmem:[%s2309_s0] sm:$0xff]  }
 0x3a6   : > { %v1844_v62 = vpop.f32.mrb[7].mxu1  ;;  %1035 = vmax.xlane.f32.xlu1 %v1034_v61  ;;  %1864 = vmatpush3.bf16.msra.mxu1 %v1988_v59  ;;  %v1989_v60 = vld [vmem:[%s2309_s0 + $0x8] sm:$0xff]  }
 0x3a7   : > { %1865 = vmatprep.subr.bf16.mxu1 %v2118_v9 }
 0x3aa   : > { %1866 = vmatpush3.bf16.msra.mxu1 %v1989_v60 }
 0x3ab   : > { %v1138_v63 = vpop.f32.mrb[8].mxu1  ;;  %1879 = vmatprep.subr.bf16.mxu1 %v2118_v9 }
 0x3ac   : > { %v1144_v0 = vsel %vm2404_vm8, %v1138_v63, -1e+30  ;;  %v1855_v2 = vpop.f32.mrb[9].mxu1 }
 0x3ad   : > { %v1141_v3 = vpop.f32.mrb[10].mxu1  ;;  %v1145_v4 = vsel %vm762_vm3, %v1144_v0, -inf }
 0x3ae   : > { %1146 = vmax.xlane.f32.xlu0 %v1145_v4  ;;  %v1856_v5 = vpop.f32.mrb[11].mxu1 }
 0x427   : > { %v812_v6 = vpop.xlane.xlu1 %811 }
 0x428   : > { %v813_v7 = vsub.f32 %v809_v46, %v812_v6 }
 0x42a   : > { %v814_v8 = vmul.f32 1.442695, %v813_v7 }
 0x42b   : > { %v925_v10 = vpop.xlane.xlu0 %924 }
 0x42c   : > { %2002 = vpow2.f32 %v814_v8  ;;  %v926_v11 = vsub.f32 %v922_v52, %v925_v10 }
 0x42e   : > { %v927_v12 = vmul.f32 1.442695, %v926_v11 }
 0x430   : > { %2004 = vpow2.f32 %v927_v12 }
 0x433   : > { %v1036_v22 = vpop.xlane.xlu1 %1035 }
 0x434   : > { %v1037_v23 = vsub.f32 %v1033_v58, %v1036_v22 }
 0x436   : > { %v2003_v13 = vpop.eup %2002  ;;  %v1038_v24 = vmul.f32 1.442695, %v1037_v23 }
 0x437   : > { %v816_v14 = vsel %vm762_vm3, %v2003_v13, 0.0 }
 0x438   : > { %817 = vadd.xlane.f32.xlu1 %v816_v14  ;;  %v1745_v14 = vld [vmem:[%s2628_s20] ss:$0 sm:$0xff] }
 0x43a   : > { %v2005_v15 = vpop.eup %2004 }
 0x43b   : > { %v1147_v16 = vpop.xlane.xlu0 %1146  ;;  %v929_v17 = vsel %vm762_vm3, %v2005_v15, 0.0 }
 0x43c   : > { %v1148_v18 = vsub.f32 %v1144_v0, %v1147_v16  ;;  %930 = vadd.xlane.f32.xlu0 %v929_v17 }
 0x43e   : > { %v1149_v19 = vmul.f32 1.442695, %v1148_v18 }
 0x440   : > { %2006 = vpow2.f32 %v1149_v19 }
 0x441   : > { %2008 = vpow2.f32 %v1038_v24 }
 0x449   : > { %822 = vrot.lane.b32.xlu1 %v2378_v27, %s2127_s16 }
 0x44a   : > { %v2007_v20 = vpop.eup %2006 }
 0x44b   : > { %v1151_v21 = vsel %vm762_vm3, %v2007_v20, 0.0  ;;  %v2009_v25 = vpop.eup %2008 }
 0x44c   : > { %1152 = vadd.xlane.f32.xlu0 %v1151_v21  ;;  %v1040_v26 = vsel %vm762_vm3, %v2009_v25, 0.0 }
 0x462   : > { %935 = vrot.lane.b32.xlu0 %v2378_v27, %s2128_s28 }
 0x46d   : > { %1041 = vadd.xlane.f32.xlu1 %v1040_v26 }
 0x47e   : > { %1046 = vrot.lane.b32.xlu1 %v2378_v27, %s2129_s23 }
 0x482   : > { %1157 = vrot.lane.b32.xlu1 %v2378_v27, %s2130_s22 }
 0x4c5   : > { %v818_v28 = vpop.xlane.xlu1 %817 }
 0x4c6   : > { %2010 = vrcp.f32 %v818_v28  ;;  %v1990_v28 = vld [vmem:[%s2326_s18] sm:$0xff]  }
 0x4c9   : > { %v823_v29 = vpop.permute.xlu1 %822  ;;  %v931_v31 = vpop.xlane.xlu0 %930 }
 0x4ca   : > { %v829_v30 = vsel %vm827_vm9, %v823_v29, 0  ;;  %2012 = vrcp.f32 %v931_v31  ;;  %v1991_v29 = vld [vmem:[%s2326_s18 + $0x8] sm:$0xff]   ;;  %v1994_v31 = vld [vmem:[%s2340_s27 + $0x10] sm:$0xff]  }
 0x4cb   : > { %1822 = vmatpush3.bf16.msra.mxu0 %v829_v30  ;;  %v1993_v30 = vld [vmem:[%s2340_s27 + $0x8] sm:$0xff]  }
 0x4cc   : > { %1833 = vmatprep.subr.bf16.mxu0 %v2118_v9 }
 0x4d0   : > { %v2011_v32 = vpop.eup %2010 }
 0x4d1   : > { %v820_v33 = vmul.f32 %v2011_v32, %v2003_v13 }
 0x4d3   : > { %v821_v34 = vpack.c.bf16 %v820_v33, %v820_v33 }
 0x4d4   : > { %v2013_v27 = vpop.eup %2012 }
 0x4d5   : > { %1824 = vmatmul.mubr.msk.bf16.vlgmr.msra.gmra.mrb[8].mxu0 %vm762_vm3, %v821_v34  ;;  %v933_v36 = vmul.f32 %v2013_v27, %v2005_v15 }
 0x4d6   : > { %1835 = vmatprep.mubr.msk.bf16.mxu0 %vm2119_vm2, %v2118_v9 }
 0x4d7   : > { %v934_v39 = vpack.c.bf16 %v933_v36, %v933_v36 }
 0x4d9   : > { %v1153_v35 = vpop.xlane.xlu0 %1152 }
 0x4dd   : > { %v936_v37 = vpop.permute.xlu0 %935 }
 0x4de   : > { %v941_v38 = vsel %vm827_vm9, %v936_v37, 0  ;;  %v1750_v37 = vld [vmem:[%s623_s3] ss:$0 sm:$0xff] }
 0x4df   : > { %1834 = vmatpush3.bf16.msra.mxu0 %v941_v38 }
 0x4e0   : > { %1845 = vmatprep.subr.bf16.mxu0 %v2118_v9 }
 0x4e2   : > { %1836 = vmatmul.mubr.msk.bf16.vlgmr.msra.gmra.mrb[12].mxu0 %vm762_vm3, %v934_v39 }
 0x4e3   : > { %1847 = vmatprep.mubr.msk.bf16.mxu0 %vm2119_vm2, %v2118_v9 }
 0x4fa   : > { %v1042_v40 = vpop.xlane.xlu1 %1041 }
 0x4fb   : > { %2014 = vrcp.f32 %v1042_v40 }
 0x4fc   : > { %2016 = vrcp.f32 %v1153_v35  ;;  %v1749_v35 = vld [vmem:[%s2629_s5] ss:$0 sm:$0xff] }
 0x4fe   : > { %v1047_v41 = vpop.permute.xlu1 %1046 }
 0x4ff   : > { %v1052_v42 = vsel %vm827_vm9, %v1047_v41, 0  ;;  %v1995_v41 = vld [vmem:[%s2340_s27 + $0x18] sm:$0xff]  }
 0x500   : > { %1846 = vmatpush3.bf16.msra.mxu0 %v1052_v42  ;;  %v1996_v42 = vld [vmem:[%s2340_s27 + $0x20] sm:$0xff]  }
 0x501   : > { %1857 = vmatprep.subr.bf16.mxu0 %v2118_v9 }
 0x502   : > { %v1158_v45 = vpop.permute.xlu1 %1157 }
 0x503   : > { %v1163_v48 = vsel %vm827_vm9, %v1158_v45, 0  ;;  %v1999_v45 = vld [vmem:[%s2340_s27 + $0x38] sm:$0xff]  }
 0x505   : > { %v2015_v43 = vpop.eup %2014 }
 0x506   : > { %v1044_v44 = vmul.f32 %v2015_v43, %v2009_v25  ;;  %v2017_v47 = vpop.eup %2016  ;;  %v1997_v43 = vld [vmem:[%s2340_s27 + $0x28] sm:$0xff]  }
 0x507   : > { %v1155_v49 = vmul.f32 %v2017_v47, %v2007_v20 }
 0x508   : > { %v1045_v46 = vpack.c.bf16 %v1044_v44, %v1044_v44  ;;  %v1998_v44 = vld [vmem:[%s2340_s27 + $0x30] sm:$0xff]  }
 0x509   : > { %v1156_v50 = vpack.c.bf16 %v1155_v49, %v1155_v49 }
 0x50a   : > { %1848 = vmatmul.mubr.msk.bf16.vlgmr.msra.gmra.mrb[16].mxu0 %vm762_vm3, %v1045_v46  ;;  %v1751_v46 = vld [vmem:[%s631_s19] ss:$0 sm:$0xff]  ;;  %s2630_s19 = sld [smem:[#allocation9_spill]] }
 0x50b   : > { %1858 = vmatpush3.bf16.msra.mxu0 %v1163_v48  ;;  %1859 = vmatprep.mubr.msk.bf16.mxu0 %vm2119_vm2, %v2118_v9 }
 0x50c   : > { %1871 = vmatprep.subr.bf16.mxu0 %v2118_v9 }
 0x510   : > { %p1764_p1 = scmp.ne.s32.totalorder %s2630_s19, 1 }
 0x512   : > { %1860 = vmatmul.mubr.msk.bf16.vlgmr.msra.gmra.mrb[20].mxu0 %vm762_vm3, %v1156_v50 }
 0x513   : > { %1875 = vmatprep.mubr.msk.bf16.mxu0 %vm2119_vm2, %v2118_v9  ;;  %1872 = vmatpush3.bf16.msra.mxu0 %v1990_v28 }
 0x514   : > { %1873 = vmatprep.subr.bf16.mxu0 %v2118_v9 }
 0x517   : > { %1874 = vmatpush3.bf16.msra.mxu0 %v1991_v29 }
 0x5a8   : > { %v865_v51 = vpop.f32.mrb[8].mxu0 }
 0x5a9   : > { %v1825_v52 = vpop.f32.mrb[9].mxu0 }
 0x5aa   : > { %v868_v53 = vpop.f32.mrb[10].mxu0 }
 0x5ab   : > { %v1826_v54 = vpop.f32.mrb[11].mxu0 }
 0x5b5   : > { %v977_v55 = vpop.f32.mrb[12].mxu0 }
 0x5b6   : > { %1206 = vrot.lane.b32.xlu0 %v977_v55, %s2131_s14  ;;  %v1837_v56 = vpop.f32.mrb[13].mxu0 }
 0x5b7   : > { %v980_v57 = vpop.f32.mrb[14].mxu0 }
 0x5b8   : > { %v1838_v58 = vpop.f32.mrb[15].mxu0  ;;  %v1755_v57 = vld [vmem:[%s639_s25] ss:$0 sm:$0xff] }
 0x5dd   : > { %v1088_v61 = vpop.f32.mrb[16].mxu0 }
 0x5de   : > { %1210 = vrot.lane.b32.xlu1 %v1088_v61, %s2132_s24  ;;  %v1849_v62 = vpop.f32.mrb[17].mxu0 }
 0x5df   : > { %v1091_v63 = vpop.f32.mrb[18].mxu0 }
 0x5e0   : > { %v1850_v0 = vpop.f32.mrb[19].mxu0 }
 0x5e5   : > { %v1199_v2 = vpop.f32.mrb[20].mxu0 }
 0x5e6   : > { %1214 = vrot.lane.b32.xlu0 %v1199_v2, %s2133_s15  ;;  %v1861_v3 = vpop.f32.mrb[21].mxu0 }
 0x5e7   : > { %v1202_v4 = vpop.f32.mrb[22].mxu0 }
 0x5e8   : > { %v1862_v5 = vpop.f32.mrb[23].mxu0 }
 0x628   : > { %v1207_v6 = vpop.permute.xlu0 %1206 }
 0x629   : > { %v1217_v8 = vsel %vm762_vm3, %v865_v51, %v1207_v6 }
 0x650   : > { %v1211_v7 = vpop.permute.xlu1 %1210 }
 0x651   : > { %v1219_v10 = vsel %vm1218_vm10, %v1217_v8, %v1211_v7 }
 0x658   : > { %v1215_v11 = vpop.permute.xlu0 %1214 }
 0x659   : > { %v1221_v12 = vsel %vm1220_vm11, %v1219_v10, %v1215_v11 }
 0x65a   : > { %v1222_v13 = vpack.c.bf16 %v1221_v12, %v1221_v12 }
 0x65c   : > { %1868 = vmatmul.mubr.msk.bf16.vlgmr.msra.gmra.mrb[12].mxu1 %vm651_vm1, %v1222_v13 }
 0x65d   : > { %1895 = vmatprep.mubr.msk.bf16.mxu1 %vm2119_vm2, %v2118_v9 }
 0x72f   : > { %v1283_v15 = vpop.f32.mrb[12].mxu1 }
 0x730   : > { %v1284_v16 = vadd.f32 %v1745_v14, %v1283_v15  ;;  %v1869_v17 = vpop.f32.mrb[13].mxu1 }
 0x731   : > { %v1286_v18 = vpop.f32.mrb[14].mxu1 }
 0x732   : > { %v2462_v19 = vadd.f32 %v1284_v16, %v2344_v1  ;;  %v1870_v20 = vpop.f32.mrb[15].mxu1  ;;  %v1992_v1 = vld [vmem:[%s2340_s27] sm:$0xff]  }
 0x733   : > { %1880 = vmatpush3.bf16.msra.mxu1 %v1992_v1 }
 0x734   : > { %v1292_v21 = vsel %vm651_vm1, %v2462_v19, 0.0  ;;  %1881 = vmatprep.subr.bf16.mxu1 %v2118_v9 }
 0x735   : > { %1293 = vadd.xlane.f32.xlu1 %v1292_v21 }
 0x737   : > { %1882 = vmatpush3.bf16.msra.mxu1 %v1993_v30 }
 0x738   : > { %1883 = vmatprep.subr.bf16.mxu1 %v2118_v9 }
 0x73b   : > { %1884 = vmatpush3.bf16.msra.mxu1 %v1994_v31 }
 0x73c   : > { %1885 = vmatprep.subr.bf16.mxu1 %v2118_v9 }
 0x73f   : > { %1886 = vmatpush3.bf16.msra.mxu1 %v1995_v41 }
 0x740   : > { %1887 = vmatprep.subr.bf16.mxu1 %v2118_v9 }
 0x743   : > { %1888 = vmatpush3.bf16.msra.mxu1 %v1996_v42 }
 0x744   : > { %1889 = vmatprep.subr.bf16.mxu1 %v2118_v9 }
 0x747   : > { %1890 = vmatpush3.bf16.msra.mxu1 %v1997_v43 }
 0x748   : > { %1891 = vmatprep.subr.bf16.mxu1 %v2118_v9 }
 0x74b   : > { %1892 = vmatpush3.bf16.msra.mxu1 %v1998_v44 }
 0x74c   : > { %1893 = vmatprep.subr.bf16.mxu1 %v2118_v9 }
 0x74f   : > { %1894 = vmatpush3.bf16.msra.mxu1 %v1999_v45 }
 0x7c2   : > { %v1294_v22 = vpop.xlane.xlu1 %1293 }
 0x7c3   : > { %v1295_v23 = vmul.f32 0.03125, %v1294_v22 }
 0x7c5   : > { %v1296_v24 = vsub.f32 %v2462_v19, %v1295_v23 }
 0x7c7   : > { %v1297_v25 = vmul.f32 %v1296_v24, %v1296_v24 }
 0x7c9   : > { %v1298_v26 = vsel %vm651_vm1, %v1297_v25, 0.0 }
 0x7ca   : > { %1299 = vadd.xlane.f32.xlu0 %v1298_v26 }
 0x857   : > { %v1300_v32 = vpop.xlane.xlu0 %1299 }
 0x858   : > { %v1301_v33 = vmul.f32 0.03125, %v1300_v32 }
 0x85a   : > { %v1302_v34 = vadd.f32 1e-05, %v1301_v33 }
 0x85c   : > { %2018 = vrsqrt.f32 %v1302_v34 }
 0x866   : > { %v2019_v27 = vpop.eup %2018 }
 0x867   : > { %v1304_v36 = vmul.f32 %v2019_v27, %v1296_v24 }
 0x869   : > { %v1311_v38 = vmul.f32 %v1749_v35, %v1304_v36 }
 0x86b   : > { %v1318_v39 = vadd.f32 %v1750_v37, %v1311_v38 }
 0x86d   : > { %v1319_v40 = vpack.c.bf16 %v1318_v39, %v1318_v39 }
 0x86f   : > { %1876 = vmatmul.mubr.msk.bf16.vlgmr.msra.gmra.mrb[24].mxu0 %vm651_vm1, %v1319_v40 }
 0x942   : > { %v1380_v47 = vpop.f32.mrb[24].mxu0 }
 0x943   : > { %v1381_v48 = vadd.f32 %v1751_v46, %v1380_v47  ;;  %v1877_v49 = vpop.f32.mrb[25].mxu0 }
 0x944   : > { %v1383_v50 = vpop.f32.mrb[26].mxu0 }
 0x945   : > { %v1388_v51 = vmul.f32 0.70710677, %v1381_v48  ;;  %v1878_v52 = vpop.f32.mrb[27].mxu0  ;;  %v1386_v54 = vmul.f32 0.5, %v1381_v48 }
 0x947   : > { %2020 = verf.f32 %v1388_v51 }
 0x951   : > { %v2021_v53 = vpop.eup %2020 }
 0x952   : > { %v1390_v55 = vadd.f32 1.0, %v2021_v53 }
 0x954   : > { %v1391_v56 = vmul.f32 %v1390_v55, %v1386_v54 }
 0x956   : > { %v1392_v9 = vpack.c.bf16 %v1391_v56, %v1391_v56 }
 0x958   : > { %1896 = vmatmul.mubr.bf16.vlgmr.msra.gmra.mrb[16].mxu1 %v1392_v9 }
 0xa2a   : > { %1509 = sbr.rel (%p1764_p1) target bundleno = 2609 (0xa31), region = 80 }
 0xa2b   : > { %v1498_v58 = vpop.f32.mrb[16].mxu1 }
 0xa2c   : > { %v1499_v59 = vadd.f32 %v1755_v57, %v1498_v58  ;;  %v1897_v60 = vpop.f32.mrb[17].mxu1 }
 0xa2d   : > { %v1501_v61 = vpop.f32.mrb[18].mxu1 }
 0xa2e   : > { %v1504_v62 = vadd.f32 %v1499_v59, %v2462_v19  ;;  %v1898_v63 = vpop.f32.mrb[19].mxu1 }
 0xa30   : > { %1505 = vst.msk [vmem:[#allocation2] sm:$0xff] %vm651_vm1, %v1504_v62  ;;  %1510 = vst.msk [vmem:[%s591_s26] sm:$0xff] (!%p1764_p1), %vm651_vm1, %v1504_v62 }
 0xa31 PF: > { %s2631_s23 = sld [smem:[#allocation10_spill]]  ;;  %s2632_s30 = sld [smem:[#allocation7_spill]] }
 0xa32   : > { %s2634_s15 = sld [smem:[#allocation23_spill]]  ;;  %s1525_s20 = sshll.u32 %s591_s26, 4  ;;  %s1526_s20 = int_to_ptr.vmem [resolvable:$true] %s1525_s20 }
 0xa33   : > { %s2022_s5 = scalar_lea.vmem %s1526_s20, 128  ;;  %s2134_s13 = smov [#allocation3]  }
 0xa34   : > { %p2023_p2 = scmp.ne.s32.totalorder %s1526_s20, %s2022_s5  ;;  %s2026_s29 = sshll.u32 %s2134_s13, 4  ;;  %s2027_s29 = int_to_ptr.vmem [resolvable:$false] %s2026_s29 }
 0xa35   : > { %s2028_s3 = scalar_lea.vmem %s2027_s29, 256  ;;  %p2029_p6 = scmp.lt.s32.totalorder %s1526_s20, %s2027_s29 }
 0xa36   : > { %p2024_p4 = pnand %p2023_p2, %p2254_p3  ;;  %p2030_p7 = scmp.lt.s32.totalorder %s2028_s3, %s2022_s5 }
 0xa37   : > { %s1766_s22 = sshll.u32 %s2631_s23, 7  ;;  %s2636_s18 = sand.u32 1, %s2632_s30  }
 0xa38   : > { %s2635_s0 = smov %s2634_s15  ;;  %s2517_s21 = scalar_lea.hbm %s2634_s15, %s1766_s22 }
 0xa39   : > { %s1512_s2 = scalar_lea.sflag [#allocation4], %s2636_s18  ;;  %p2025_p5 = pneg %p2024_p4 }
 0xa3a   : > { %p2031_p8 = por %p2030_p7, %p2029_p6 }
 0xa3c   : > { %p2032_p10 = pnand %p2031_p8, %p2025_p5 }
 0xa3e   : > { %2035 = shalt.err (!%p2032_p10)
}
 0xa3f   : > { %s2036_s17 = scalar_lea.hbm %s2517_s21, 128  ;;  %s2040_s27 = scalar_lea.hbm %s2635_s0, 256 }
 0xa40   : > { %p2037_p11 = scmp.ne.s32.totalorder %s2517_s21, %s2036_s17  ;;  %p2041_p0 = scmp.lt.u32.totalorder %s2517_s21, %s2635_s0 }
 0xa41   : > { %p2042_p1 = scmp.lt.u32.totalorder %s2040_s27, %s2036_s17  ;;  %p2044_p4 = scmp.lt.u32.totalorder %s2036_s17, %s2517_s21 }
 0xa42   : > { %p2038_p12 = pnand %p2037_p11, %p2254_p3 }
 0xa43   : > { %p2043_p2 = por %p2042_p1, %p2041_p0 }
 0xa44   : > { %p2039_p13 = pneg %p2038_p12 }
 0xa45   : > { %p2045_p5 = por %p2044_p4, %p2043_p2 }
 0xa47   : > { %p2046_p6 = pnand %p2045_p5, %p2039_p13 }
 0xa49   : > { %2049 = shalt.err (!%p2046_p6)
}
 0xa4a   : > { %1899 = dma.vmem_to_hbm [thread:$0]  (%p2254_p3), %s1526_s20, 128, %s2517_s21, %s1512_s2  }
 0xa4b PF: > { %s2637_s23 = sld [smem:[#allocation13_spill]]  ;;  %s2638_s30 = sld [smem:[#allocation6_spill]] }
 0xa51   : > { %p1905_p7 = scmp.ge.s32.totalorder %s2637_s23, 2  ;;  %s1537_s14 = sand.u32 1, %s2638_s30  }
 0xa52   : > { %s1538_s24 = scalar_lea.sflag [#allocation4], %s1537_s14 }
 0xa53   : > { %p1902_p8 = pnand %p1905_p7, %p2264_p9 }
 0xa55   : > { %2083 = dma.done.wait (!%p1902_p8), %s1538_s24, 128  }
 0xa56   : > { %2085 = vsyncadd (!%p1902_p8), %s1538_s24, 4294967168  ;;  %s26_s15 = sadd.s32 1, %s2637_s23   ;;  %s2640_s25 = sld [smem:[#allocation7_spill]] }
 0xa57   : > { %p23_p10 = scmp.ge.s32.totalorder %s26_s15, 6   ;;  %s2641_s26 = sld [smem:[#allocation8_spill]] }
 0xa58   : > { %s2642_s27 = sld [smem:[#allocation18_spill]]  ;;  %s2643_s28 = sld [smem:[#allocation11_spill]] }
 0xa59   : > { %s2644_s29 = sld [smem:[#allocation12_spill]]  ;;  %s2645_s30 = sld [smem:[#allocation14_spill]] }
 0xa5a   : > { %s2646_s14 = sld [smem:[#allocation16_spill]]  ;;  %25 = sbr.rel (!%p23_p10) target bundleno = 11 (0xb), region = 151 }
 0xa61   :  { %1543 = vsyncpa [#allocation4], 1 }
 0xa62   :  { %1545 = vsyncpa [#allocation4 + $0x1], 1 }

</bundles_post_ra>
